<compile_context>
chip_gen: v5e
topology: v5e:2x2
jax: 0.10.0
libtpu: 0.0.40
codegen_flags: <defaults>
</compile_context>

<pallas_src>
import functools
import math

import jax
import jax.numpy as jnp
from jax import lax
from jax.experimental import pallas as pl
from jax.experimental.pallas import tpu as pltpu

_MASK_VALUE = -1e30  # large finite negative: robust even if a tile is fully masked


def _round_up(x, m):
    return ((x + m - 1) // m) * m


def _flash_kernel(q_ref, k_ref, v_ref, o_ref, m_sc, l_sc, acc_sc, *,
                  seq_len, mask_kv, tkv):
    # q_ref: (1, tq, E)   k_ref/v_ref: (1, tkv, E)   o_ref: (1, tq, E)
    kv_idx = pl.program_id(2)
    last_kv = pl.num_programs(2) - 1

    @pl.when(kv_idx == 0)
    def _init():
        m_sc[...] = jnp.full_like(m_sc, -jnp.inf)
        l_sc[...] = jnp.zeros_like(l_sc)
        acc_sc[...] = jnp.zeros_like(acc_sc)

    q = q_ref[0]  # bf16, already scaled by 1/sqrt(E)
    k = k_ref[0]  # bf16
    v = v_ref[0]  # bf16

    # scores = q @ k^T, contraction on the last dims (MXU-native), f32 accumulate.
    s = lax.dot_general(q, k, (((1,), (1,)), ((), ())),
                        preferred_element_type=jnp.float32)  # (tq, tkv)

    def update(scores):
        m_prev = m_sc[...]                                       # (tq, 1)
        m_new = jnp.maximum(m_prev, jnp.max(scores, axis=-1, keepdims=True))
        alpha = jnp.exp(m_prev - m_new)
        p = jnp.exp(scores - m_new)                              # (tq, tkv) f32
        l_sc[...] = alpha * l_sc[...] + jnp.sum(p, axis=-1, keepdims=True)
        acc_sc[...] = alpha * acc_sc[...] + lax.dot_general(
            p.astype(v.dtype), v, (((1,), (0,)), ((), ())),
            preferred_element_type=jnp.float32)
        m_sc[...] = m_new

    if mask_kv:
        # Padded KV columns only exist in the last KV tile -> gate the mask
        # (iota/compare/select) so interior iterations skip it entirely.
        is_last = kv_idx == last_kv

        @pl.when(is_last)
        def _masked():
            tq = s.shape[0]
            col = kv_idx * tkv + lax.broadcasted_iota(jnp.int32, (tq, tkv), 1)
            update(jnp.where(col < seq_len, s, _MASK_VALUE))

        @pl.when(jnp.logical_not(is_last))
        def _unmasked():
            update(s)
    else:
        update(s)

    # TODO(synk): training-mode dropout (p=0.1) on the attention probs would use
    # pltpu.prng_seed + pltpu.stateful_bernoulli here; eval-mode dropout is identity.

    @pl.when(kv_idx == last_kv)
    def _finalize():
        # Exact divide (finalize-only cost); keeps f32-output accuracy.
        o_ref[0] = (acc_sc[...] / l_sc[...]).astype(o_ref.dtype)


def scaled_dot_product_attention(qkv, *, tq=256, tkv=256,
                                 compute_dtype=jnp.bfloat16):
    """qkv: (B, S, 3*E) -> (B, S, E).  Eval-mode dropout (identity).

    Defaults (tq=tkv=256) are good on v5e/v6e/v7x; v6e benefits from tq up to
    512.  Tiles are clamped for small S (tq >= 16, tkv >= 128 for lane-dense
    score tiles).  VMEM use is ~1 MiB/step at defaults -- far below all limits.
    """
    B, S, three_e = qkv.shape
    assert three_e % 3 == 0
    E = three_e // 3
    scale = 1.0 / math.sqrt(E)

    # Tile clamps: keep score-tile lane dim >= 128, bf16 sublane packing >= 16.
    tq = max(16, min(tq, _round_up(S, 16)))
    tkv = max(128, min(tkv, _round_up(S, 128)))

    # Independent padding for the q and kv extents (no lcm over-padding).
    s_pad_q = _round_up(S, tq)
    s_pad_kv = _round_up(S, tkv)
    mask_kv = (s_pad_kv != S)

    if E % 128 == 0:
        # Fast path: no q/k/v split copy.  One fused scale*cast pass, then the
        # fused qkv tensor feeds three BlockSpecs via last-dim block index 0/1/2.
        e_pad = E
        scale_vec = jnp.concatenate([
            jnp.full((E,), scale, dtype=qkv.dtype),
            jnp.ones((2 * E,), dtype=qkv.dtype),
        ])
        x = (qkv * scale_vec).astype(compute_dtype)
        s_pad = max(s_pad_q, s_pad_kv)
        if s_pad != S:
            x = jnp.pad(x, ((0, 0), (0, s_pad - S), (0, 0)))
        q_in = k_in = v_in = x
        in_specs = [
            pl.BlockSpec((1, tq, E), lambda b, qi, ki: (b, qi, 0)),
            pl.BlockSpec((1, tkv, E), lambda b, qi, ki: (b, ki, 1)),
            pl.BlockSpec((1, tkv, E), lambda b, qi, ki: (b, ki, 2)),
        ]
    else:
        # Split path (E not lane-aligned): per-tensor slice + scale + cast + pad,
        # each a single fused XLA pass; Q gets the 1/sqrt(E) scale folded in.
        e_pad = _round_up(E, 128)
        q = (qkv[:, :, :E] * scale).astype(compute_dtype)
        k = qkv[:, :, E:2 * E].astype(compute_dtype)
        v = qkv[:, :, 2 * E:].astype(compute_dtype)
        q_in = jnp.pad(q, ((0, 0), (0, s_pad_q - S), (0, e_pad - E)))
        k_in = jnp.pad(k, ((0, 0), (0, s_pad_kv - S), (0, e_pad - E)))
        v_in = jnp.pad(v, ((0, 0), (0, s_pad_kv - S), (0, e_pad - E)))
        in_specs = [
            pl.BlockSpec((1, tq, e_pad), lambda b, qi, ki: (b, qi, 0)),
            pl.BlockSpec((1, tkv, e_pad), lambda b, qi, ki: (b, ki, 0)),
            pl.BlockSpec((1, tkv, e_pad), lambda b, qi, ki: (b, ki, 0)),
        ]

    grid = (B, s_pad_q // tq, s_pad_kv // tkv)
    kernel = functools.partial(_flash_kernel, seq_len=S, mask_kv=mask_kv, tkv=tkv)

    out = pl.pallas_call(
        kernel,
        out_shape=jax.ShapeDtypeStruct((B, s_pad_q, e_pad), qkv.dtype),
        grid_spec=pltpu.PrefetchScalarGridSpec(
            num_scalar_prefetch=0,
            grid=grid,
            in_specs=in_specs,
            out_specs=pl.BlockSpec((1, tq, e_pad), lambda b, qi, ki: (b, qi, 0)),
            scratch_shapes=[
                pltpu.VMEM((tq, 1), jnp.float32),       # running max
                pltpu.VMEM((tq, 1), jnp.float32),       # running sum
                pltpu.VMEM((tq, e_pad), jnp.float32),   # f32 accumulator
            ],
        ),
        compiler_params=pltpu.CompilerParams(
            dimension_semantics=("parallel", "parallel", "arbitrary"),
        ),
    )(q_in, k_in, v_in)

    if s_pad_q != S or e_pad != E:
        out = out[:, :S, :E]
    return out


def _reference(qkv):
    """Pure-JAX f32 reference mirroring the PyTorch forward (eval mode)."""
    E = qkv.shape[-1] // 3
    q = qkv[:, :, :E] / math.sqrt(E)
    k = qkv[:, :, E:2 * E]
    v = qkv[:, :, 2 * E:]
    s = jnp.einsum("bqe,bke->bqk", q, k)
    p = jax.nn.softmax(s, axis=-1)
    return jnp.einsum("bqk,bke->bqe", p, v)


if __name__ == "__main__":
    key = jax.random.PRNGKey(0)
    k0, k1, k2 = jax.random.split(key, 3)

    # Primary: module-implied small shape (B=2, S=8, E=32 -> qkv last dim 96).
    qkv = jax.random.normal(k0, (2, 8, 3 * 32), dtype=jnp.float32)
    out = jax.block_until_ready(scaled_dot_product_attention(qkv))
    ref = _reference(qkv)
    assert out.shape == (2, 8, 32)
    # bf16 MXU streams vs f32 reference -> dominant error source; tolerance reflects it.
    assert jnp.allclose(out, ref, atol=5e-2, rtol=5e-2)

    # Multi-tile path: multiple q and kv tiles, independent q/kv padding,
    # gated KV mask on the last tile only.
    qkv2 = jax.random.normal(k1, (2, 200, 3 * 64), dtype=jnp.float32)
    out2 = jax.block_until_ready(
        scaled_dot_product_attention(qkv2, tq=128, tkv=128))
    assert jnp.allclose(out2, _reference(qkv2), atol=5e-2, rtol=5e-2)

    # Lane-aligned fast path (E % 128 == 0): fused qkv passed directly,
    # no wrapper split copy, no padding, no mask.
    qkv3 = jax.random.normal(k2, (1, 256, 3 * 128), dtype=jnp.float32)
    out3 = jax.block_until_ready(
        scaled_dot_product_attention(qkv3, tq=128, tkv=128))
    assert jnp.allclose(out3, _reference(qkv3), atol=5e-2, rtol=5e-2)

    print("KERNEL_OK")
</pallas_src>

<mosaic_0001>
module attributes {stable_mosaic.version = 11 : i64} {
  func.func @_flash_kernel(%arg0: i32, %arg1: i32, %arg2: i32, %arg3: memref<1x16x128xbf16, #tpu.memory_space<vmem>>, %arg4: memref<1x128x128xbf16, #tpu.memory_space<vmem>>, %arg5: memref<1x128x128xbf16, #tpu.memory_space<vmem>>, %arg6: memref<1x16x128xf32, #tpu.memory_space<vmem>>, %arg7: memref<16x1xf32, #tpu.memory_space<vmem>>, %arg8: memref<16x1xf32, #tpu.memory_space<vmem>>, %arg9: memref<16x128xf32, #tpu.memory_space<vmem>>) attributes {dimension_semantics = [#tpu.dimension_semantics<parallel>, #tpu.dimension_semantics<parallel>, #tpu.dimension_semantics<arbitrary>], iteration_bounds = array<i64: 2, 1, 1>, scalar_prefetch = 0 : i64, scratch_operands = 3 : i64, tpu.core_type = #tpu.core_type<tc>, window_params = [{transform_indices = @transform_0, window_bounds = array<i64: 1, 16, 128>}, {transform_indices = @transform_1, window_bounds = array<i64: 1, 128, 128>}, {transform_indices = @transform_2, window_bounds = array<i64: 1, 128, 128>}, {transform_indices = @transform_3, window_bounds = array<i64: 1, 16, 128>}]} {
    %c0_i32 = arith.constant 0 : i32
    %0 = arith.cmpi eq, %arg2, %c0_i32 : i32
    %1 = arith.extui %0 : i1 to i32
    %c0_i32_0 = arith.constant 0 : i32
    %2 = arith.cmpi ne, %1, %c0_i32_0 : i32
    scf.if %2 {
      %cst_14 = arith.constant 0xFF800000 : f32
      %19 = vector.broadcast %cst_14 : f32 to vector<16x1xf32>
      %c0_15 = arith.constant 0 : index
      %c0_16 = arith.constant 0 : index
      %20 = vector.load %arg7[%c0_15, %c0_16] : memref<16x1xf32, #tpu.memory_space<vmem>>, vector<16x1xf32>
      tpu.vector_store %arg7[%c0_15, %c0_16], %19 {strides = array<i32>} : memref<16x1xf32, #tpu.memory_space<vmem>>, vector<16x1xf32>,
      %cst_17 = arith.constant 0.000000e+00 : f32
      %21 = vector.broadcast %cst_17 : f32 to vector<16x1xf32>
      %c0_18 = arith.constant 0 : index
      %c0_19 = arith.constant 0 : index
      %22 = vector.load %arg8[%c0_18, %c0_19] : memref<16x1xf32, #tpu.memory_space<vmem>>, vector<16x1xf32>
      tpu.vector_store %arg8[%c0_18, %c0_19], %21 {strides = array<i32>} : memref<16x1xf32, #tpu.memory_space<vmem>>, vector<16x1xf32>,
      %cst_20 = arith.constant 0.000000e+00 : f32
      %23 = vector.broadcast %cst_20 : f32 to vector<16x128xf32>
      %c0_21 = arith.constant 0 : index
      %c0_22 = arith.constant 0 : index
      %24 = vector.load %arg9[%c0_21, %c0_22] : memref<16x128xf32, #tpu.memory_space<vmem>>, vector<16x128xf32>
      tpu.vector_store %arg9[%c0_21, %c0_22], %23 {strides = array<i32>} : memref<16x128xf32, #tpu.memory_space<vmem>>, vector<16x128xf32>,
    } else {
    }
    %c0 = arith.constant 0 : index
    %c0_1 = arith.constant 0 : index
    %c0_2 = arith.constant 0 : index
    %3 = vector.load %arg3[%c0, %c0_1, %c0_2] : memref<1x16x128xbf16, #tpu.memory_space<vmem>>, vector<1x16x128xbf16>
    %4 = vector.shape_cast %3 : vector<1x16x128xbf16> to vector<16x128xbf16>
    %c0_3 = arith.constant 0 : index
    %c0_4 = arith.constant 0 : index
    %c0_5 = arith.constant 0 : index
    %5 = vector.load %arg4[%c0_3, %c0_4, %c0_5] : memref<1x128x128xbf16, #tpu.memory_space<vmem>>, vector<1x128x128xbf16>
    %6 = vector.shape_cast %5 : vector<1x128x128xbf16> to vector<128x128xbf16>
    %c0_6 = arith.constant 0 : index
    %c0_7 = arith.constant 0 : index
    %c0_8 = arith.constant 0 : index
    %7 = vector.load %arg5[%c0_6, %c0_7, %c0_8] : memref<1x128x128xbf16, #tpu.memory_space<vmem>>, vector<1x128x128xbf16>
    %8 = vector.shape_cast %7 : vector<1x128x128xbf16> to vector<128x128xbf16>
    %cst = arith.constant dense<0.000000e+00> : vector<16x128xf32>
    %9 = tpu.matmul %4, %6, %cst {dimension_numbers = #tpu.dot_dimension_numbers<[1], [1], [0], [0], [0, 0, 1, 0], [], []>} : vector<16x128xbf16>, vector<128x128xbf16>, vector<16x128xf32> -> vector<16x128xf32>
    %c0_i32_9 = arith.constant 0 : i32
    %10 = arith.cmpi eq, %arg2, %c0_i32_9 : i32
    %11 = arith.extui %10 : i1 to i32
    %c0_i32_10 = arith.constant 0 : i32
    %12 = arith.cmpi ne, %11, %c0_i32_10 : i32
    scf.if %12 {
      %c128_i32 = arith.constant 128 : i32
      %19 = arith.muli %arg2, %c128_i32 : i32
      %20 = tpu.iota {dimensions = array<i32: 1>} : vector<16x128xi32>
      %21 = vector.broadcast %19 : i32 to vector<16x128xi32>
      %22 = arith.addi %21, %20 : vector<16x128xi32>
      %c8_i32 = arith.constant 8 : i32
      %23 = vector.broadcast %c8_i32 : i32 to vector<16x128xi32>
      %24 = arith.cmpi slt, %22, %23 : vector<16x128xi32>
      %cst_14 = arith.constant -1.000000e+30 : f32
      %25 = vector.broadcast %cst_14 : f32 to vector<16x128xf32>
      %26 = arith.select %24, %9, %25 : vector<16x128xi1>, vector<16x128xf32>
      %c0_15 = arith.constant 0 : index
      %c0_16 = arith.constant 0 : index
      %27 = vector.load %arg7[%c0_15, %c0_16] : memref<16x1xf32, #tpu.memory_space<vmem>>, vector<16x1xf32>
      %cst_17 = arith.constant dense<0xFF800000> : vector<16xf32>
      %28 = vector.multi_reduction <maximumf>, %26, %cst_17 [1] : vector<16x128xf32> to vector<16xf32>
      %29 = vector.shape_cast %28 : vector<16xf32> to vector<16x1xf32>
      %30 = arith.maximumf %27, %29 : vector<16x1xf32>
      %31 = arith.subf %27, %30 : vector<16x1xf32>
      %32 = math.exp %31 : vector<16x1xf32>
      %33 = vector.broadcast %30 : vector<16x1xf32> to vector<16x128xf32>
      %34 = arith.subf %26, %33 : vector<16x128xf32>
      %35 = math.exp %34 : vector<16x128xf32>
      %c0_18 = arith.constant 0 : index
      %c0_19 = arith.constant 0 : index
      %36 = vector.load %arg8[%c0_18, %c0_19] : memref<16x1xf32, #tpu.memory_space<vmem>>, vector<16x1xf32>
      %37 = arith.mulf %32, %36 : vector<16x1xf32>
      %cst_20 = arith.constant dense<0.000000e+00> : vector<16xf32>
      %38 = vector.multi_reduction <add>, %35, %cst_20 [1] : vector<16x128xf32> to vector<16xf32>
      %39 = vector.shape_cast %38 : vector<16xf32> to vector<16x1xf32>
      %40 = arith.addf %37, %39 : vector<16x1xf32>
      %c0_21 = arith.constant 0 : index
      %c0_22 = arith.constant 0 : index
      %41 = vector.load %arg8[%c0_21, %c0_22] : memref<16x1xf32, #tpu.memory_space<vmem>>, vector<16x1xf32>
      tpu.vector_store %arg8[%c0_21, %c0_22], %40 {strides = array<i32>} : memref<16x1xf32, #tpu.memory_space<vmem>>, vector<16x1xf32>,
      %c0_23 = arith.constant 0 : index
      %c0_24 = arith.constant 0 : index
      %42 = vector.load %arg9[%c0_23, %c0_24] : memref<16x128xf32, #tpu.memory_space<vmem>>, vector<16x128xf32>
      %43 = vector.broadcast %32 : vector<16x1xf32> to vector<16x128xf32>
      %44 = arith.mulf %43, %42 : vector<16x128xf32>
      %45 = arith.truncf %35 : vector<16x128xf32> to vector<16x128xbf16>
      %cst_25 = arith.constant dense<0.000000e+00> : vector<16x128xf32>
      %46 = tpu.matmul %45, %8, %cst_25 {dimension_numbers = #tpu.dot_dimension_numbers<[1], [0], [0], [1], [0, 0, 1, 1], [], []>} : vector<16x128xbf16>, vector<128x128xbf16>, vector<16x128xf32> -> vector<16x128xf32>
      %47 = arith.addf %44, %46 : vector<16x128xf32>
      %c0_26 = arith.constant 0 : index
      %c0_27 = arith.constant 0 : index
      %48 = vector.load %arg9[%c0_26, %c0_27] : memref<16x128xf32, #tpu.memory_space<vmem>>, vector<16x128xf32>
      tpu.vector_store %arg9[%c0_26, %c0_27], %47 {strides = array<i32>} : memref<16x128xf32, #tpu.memory_space<vmem>>, vector<16x128xf32>,
      %c0_28 = arith.constant 0 : index
      %c0_29 = arith.constant 0 : index
      %49 = vector.load %arg7[%c0_28, %c0_29] : memref<16x1xf32, #tpu.memory_space<vmem>>, vector<16x1xf32>
      tpu.vector_store %arg7[%c0_28, %c0_29], %30 {strides = array<i32>} : memref<16x1xf32, #tpu.memory_space<vmem>>, vector<16x1xf32>,
    } else {
    }
    %true = arith.constant true
    %13 = arith.xori %10, %true : i1
    %14 = arith.extui %13 : i1 to i32
    %c0_i32_11 = arith.constant 0 : i32
    %15 = arith.cmpi ne, %14, %c0_i32_11 : i32
    scf.if %15 {
      %c0_14 = arith.constant 0 : index
      %c0_15 = arith.constant 0 : index
      %19 = vector.load %arg7[%c0_14, %c0_15] : memref<16x1xf32, #tpu.memory_space<vmem>>, vector<16x1xf32>
      %cst_16 = arith.constant dense<0xFF800000> : vector<16xf32>
      %20 = vector.multi_reduction <maximumf>, %9, %cst_16 [1] : vector<16x128xf32> to vector<16xf32>
      %21 = vector.shape_cast %20 : vector<16xf32> to vector<16x1xf32>
      %22 = arith.maximumf %19, %21 : vector<16x1xf32>
      %23 = arith.subf %19, %22 : vector<16x1xf32>
      %24 = math.exp %23 : vector<16x1xf32>
      %25 = vector.broadcast %22 : vector<16x1xf32> to vector<16x128xf32>
      %26 = arith.subf %9, %25 : vector<16x128xf32>
      %27 = math.exp %26 : vector<16x128xf32>
      %c0_17 = arith.constant 0 : index
      %c0_18 = arith.constant 0 : index
      %28 = vector.load %arg8[%c0_17, %c0_18] : memref<16x1xf32, #tpu.memory_space<vmem>>, vector<16x1xf32>
      %29 = arith.mulf %24, %28 : vector<16x1xf32>
      %cst_19 = arith.constant dense<0.000000e+00> : vector<16xf32>
      %30 = vector.multi_reduction <add>, %27, %cst_19 [1] : vector<16x128xf32> to vector<16xf32>
      %31 = vector.shape_cast %30 : vector<16xf32> to vector<16x1xf32>
      %32 = arith.addf %29, %31 : vector<16x1xf32>
      %c0_20 = arith.constant 0 : index
      %c0_21 = arith.constant 0 : index
      %33 = vector.load %arg8[%c0_20, %c0_21] : memref<16x1xf32, #tpu.memory_space<vmem>>, vector<16x1xf32>
      tpu.vector_store %arg8[%c0_20, %c0_21], %32 {strides = array<i32>} : memref<16x1xf32, #tpu.memory_space<vmem>>, vector<16x1xf32>,
      %c0_22 = arith.constant 0 : index
      %c0_23 = arith.constant 0 : index
      %34 = vector.load %arg9[%c0_22, %c0_23] : memref<16x128xf32, #tpu.memory_space<vmem>>, vector<16x128xf32>
      %35 = vector.broadcast %24 : vector<16x1xf32> to vector<16x128xf32>
      %36 = arith.mulf %35, %34 : vector<16x128xf32>
      %37 = arith.truncf %27 : vector<16x128xf32> to vector<16x128xbf16>
      %cst_24 = arith.constant dense<0.000000e+00> : vector<16x128xf32>
      %38 = tpu.matmul %37, %8, %cst_24 {dimension_numbers = #tpu.dot_dimension_numbers<[1], [0], [0], [1], [0, 0, 1, 1], [], []>} : vector<16x128xbf16>, vector<128x128xbf16>, vector<16x128xf32> -> vector<16x128xf32>
      %39 = arith.addf %36, %38 : vector<16x128xf32>
      %c0_25 = arith.constant 0 : index
      %c0_26 = arith.constant 0 : index
      %40 = vector.load %arg9[%c0_25, %c0_26] : memref<16x128xf32, #tpu.memory_space<vmem>>, vector<16x128xf32>
      tpu.vector_store %arg9[%c0_25, %c0_26], %39 {strides = array<i32>} : memref<16x128xf32, #tpu.memory_space<vmem>>, vector<16x128xf32>,
      %c0_27 = arith.constant 0 : index
      %c0_28 = arith.constant 0 : index
      %41 = vector.load %arg7[%c0_27, %c0_28] : memref<16x1xf32, #tpu.memory_space<vmem>>, vector<16x1xf32>
      tpu.vector_store %arg7[%c0_27, %c0_28], %22 {strides = array<i32>} : memref<16x1xf32, #tpu.memory_space<vmem>>, vector<16x1xf32>,
    } else {
    }
    %c0_i32_12 = arith.constant 0 : i32
    %16 = arith.cmpi eq, %arg2, %c0_i32_12 : i32
    %17 = arith.extui %16 : i1 to i32
    %c0_i32_13 = arith.constant 0 : i32
    %18 = arith.cmpi ne, %17, %c0_i32_13 : i32
    scf.if %18 {
      %c0_14 = arith.constant 0 : index
      %c0_15 = arith.constant 0 : index
      %19 = vector.load %arg9[%c0_14, %c0_15] : memref<16x128xf32, #tpu.memory_space<vmem>>, vector<16x128xf32>
      %c0_16 = arith.constant 0 : index
      %c0_17 = arith.constant 0 : index
      %20 = vector.load %arg8[%c0_16, %c0_17] : memref<16x1xf32, #tpu.memory_space<vmem>>, vector<16x1xf32>
      %21 = vector.broadcast %20 : vector<16x1xf32> to vector<16x128xf32>
      %22 = arith.divf %19, %21 : vector<16x128xf32>
      %c0_18 = arith.constant 0 : index
      %c0_19 = arith.constant 0 : index
      %c0_20 = arith.constant 0 : index
      %23 = vector.load %arg6[%c0_18, %c0_19, %c0_20] : memref<1x16x128xf32, #tpu.memory_space<vmem>>, vector<1x16x128xf32>
      %24 = vector.shape_cast %23 : vector<1x16x128xf32> to vector<16x128xf32>
      %25 = vector.shape_cast %22 : vector<16x128xf32> to vector<1x16x128xf32>
      tpu.vector_store %arg6[%c0_18, %c0_19, %c0_20], %25 {strides = array<i32>} : memref<1x16x128xf32, #tpu.memory_space<vmem>>, vector<1x16x128xf32>,
    } else {
    }
    return
  }
  func.func @transform_0(%arg0: i32, %arg1: i32, %arg2: i32) -> (i32, i32, i32) {
    %c0_i32 = arith.constant 0 : i32
    %c0_i32_0 = arith.constant 0 : i32
    return %arg0, %arg1, %c0_i32 : i32, i32, i32
  }
  func.func @transform_1(%arg0: i32, %arg1: i32, %arg2: i32) -> (i32, i32, i32) {
    %c0_i32 = arith.constant 0 : i32
    %c0_i32_0 = arith.constant 0 : i32
    return %arg0, %arg2, %c0_i32 : i32, i32, i32
  }
  func.func @transform_2(%arg0: i32, %arg1: i32, %arg2: i32) -> (i32, i32, i32) {
    %c0_i32 = arith.constant 0 : i32
    %c0_i32_0 = arith.constant 0 : i32
    return %arg0, %arg2, %c0_i32 : i32, i32, i32
  }
  func.func @transform_3(%arg0: i32, %arg1: i32, %arg2: i32) -> (i32, i32, i32) {
    %c0_i32 = arith.constant 0 : i32
    %c0_i32_0 = arith.constant 0 : i32
    return %arg0, %arg1, %c0_i32 : i32, i32, i32
  }
}

</mosaic_0001>

<bundles_post_ra>
// kernel: tpu_custom_call.1
= control target key start
LH: loop header
LB: loop body
LE: loop exit
PB: predicated region body
PF: predicated region fallthrough
CT: control target
= control target key end

     0   :  { %s1512_s0 = inlined_call_operand.hbm [shape: bf16[2,16,128], index: 0, kind: input, shape index: {}]   ;;  %s1513_s1 = inlined_call_operand.hbm [shape: bf16[2,128,128], index: 1, kind: input, shape index: {}]   ;;  %s1514_s2 = inlined_call_operand.hbm [shape: bf16[2,128,128], index: 2, kind: input, shape index: {}]   ;;  %s1515_s3 = inlined_call_operand.hbm [shape: f32[2,16,128], index: 3, kind: output, shape index: {}]  }
   0x1   :  { %1518 = sst [smem:[#allocation18_spill]] %s1513_s1 }
   0x2   :  { %8 = vsyncpa [#allocation6], 0 }
   0x3   :  { %10 = vsyncpa [#allocation6 + $0x1], 0 }
   0x4   :  { %11 = vsyncpa [#allocation9], 0 }
   0x5   :  { %13 = vsyncpa [#allocation9 + $0x1], 0 }
   0x6   :  { %14 = vsyncpa [#allocation7], 0 }
   0x7   :  { %16 = vsyncpa [#allocation7 + $0x1], 0  ;;  %s1346_s12 = smov 0   ;;  %s1348_s13 = smov 0  }
   0x8   :  { %s1350_s14 = smov 0   ;;  %s1352_s15 = smov 0  }
   0x9   :  { %s1354_s16 = smov 0   ;;  %s1356_s17 = smov 0  }
   0xa LB: > { %1519 = sst [smem:[#allocation15_spill]] %s1305_s14  ;;  %s1377_s18 = sadd.s32 4294967295, %s1317_s17   ;;  %s1317_s17 = sphi %s1356_s17, %s22_s17   ;;  %s1313_s16 = sphi %s1354_s16, %s1534_s16   ;;  %s1309_s15 = sphi %s1352_s15, %s1533_s15   ;;  %s1305_s14 = sphi %s1350_s14, %s1529_s14   ;;  %s1301_s13 = sphi %s1348_s13, %s1532_s13   ;;  %s1297_s12 = sphi %s1346_s12, %s1531_s12  }
   0xb   : > { %s896_s19 = sadd.s32 4294967294, %s1317_s17   ;;  %s41_s20 = sadd.s32 1, %s1313_s16 }
   0xc   : > { %s50_s21 = sadd.s32 1, %s1305_s14  ;;  %p43_p0 = scmp.ge.s32.totalorder %s41_s20, 2 }
   0xd   : > { %p57_p1 = scmp.ne.s32.totalorder %s1305_s14, %s1301_s13  ;;  %p58_p2 = scmp.eq.s32.totalorder %s1317_s17, 0 }
   0xe   : > { %p63_p3 = scmp.ne.s32.totalorder %s1301_s13, %s1297_s12  ;;  %s1536_s20 = smov (%p43_p0, %s41_s20), 0 }
   0xf   : > { %1520 = sst [smem:[#allocation16_spill]] %s1536_s20  ;;  %p1389_p4 = por %p58_p2, %p57_p1 }
  0x10   : > { %p64_p5 = scmp.eq.s32.totalorder %s1377_s18, 0  ;;  %s45_s23 = ssub.s32 %s1313_s16, %s1536_s20 }
  0x11   : > { %p145_p6 = scmp.eq.s32.totalorder %s1377_s18, 1  ;;  %p48_p7 = scmp.eq.s32.totalorder %s45_s23, 0 }
  0x12   : > { %p1397_p8 = por %p64_p5, %p63_p3  ;;  %p151_p10 = scmp.eq.s32.totalorder %s896_s19, 1 }
  0x13   : > { %p1401_p9 = por %p145_p6, %p57_p1  ;;  %p898_p12 = scmp.ge.s32.totalorder %s1317_s17, 2 }
  0x14   : > { %s1406_s26 = scalar_select %p48_p7, %s1305_s14, %s50_s21  }
  0x15   : > { %p1408_p11 = por %p151_p10, %p63_p3  ;;  %p1069_p13 = scmp.lt.s32.totalorder %s1317_s17, 2 }
  0x16   : > { %1524 = sst [smem:[#allocation17_spill]] %s1406_s26  ;;  %s1415_s28 = sand.u32 1, %s1305_s14  }
  0x17   : > { %p1419_p0 = pnand %p1069_p13, %p1389_p4  ;;  %s195_s30 = sand.u32 1, %s1317_s17  }
  0x18   : > { %s902_s4 = sshll.u32 %s1415_s28, 6  ;;  %s1019_s5 = sshll.u32 %s1313_s16, 6 }
  0x19   : > { %s199_s6 = scalar_lea.vmem [#allocation8], %s902_s4  ;;  %s1527_s1 = sld [smem:[#allocation18_spill]] }
  0x1a   : > { %s209_s7 = sshll.u32 %s199_s6, 4  ;;  %s230_s22 = scalar_lea.hbm %s1514_s2, %s1019_s5  ;;  %s210_s7 = int_to_ptr.vmem [resolvable:$true] %s209_s7 }
  0x1b   : > { %s196_s23 = scalar_lea.sflag [#allocation9], %s195_s30  ;;  %s1319_s20 = smov 64  }
  0x1c   : > { %s1320_s26 = smov 4   ;;  %s231_s6 = sshll.u32 %s230_s22, 4  ;;  %s232_s6 = int_to_ptr.hbm [resolvable:$true] %s231_s6 }
  0x1d   : > { %s223_s14 = scalar_lea.vmem [#allocation10], %s902_s4  ;;  %p908_p1 = scmp.ge.s32.totalorder %s1317_s17, 1 }
  0x1e   : > { %s233_s8 = sshll.u32 %s223_s14, 4  ;;  %p241_p2 = scmp.lt.s32.totalorder %s1317_s17, 3  ;;  %s234_s8 = int_to_ptr.vmem [resolvable:$true] %s233_s8 }
  0x1f   : > { %s206_s10 = scalar_lea.hbm %s1527_s1, %s1019_s5  ;;  %s899_s9 = sshll.u32 %s1415_s28, 3 }
  0x20   : > { %s207_s11 = sshll.u32 %s206_s10, 4  ;;  %p242_p3 = pnand %p908_p1, %p241_p2  ;;  %s208_s11 = int_to_ptr.hbm [resolvable:$true] %s207_s11 }
  0x21   : > { %1061 = dma.hbm_to_vmem [thread:$0]  (!%p1419_p0), %s208_s11, 1024, %s210_s7, %s196_s23, %s1319_s20, %s1319_s20, %s1320_s26  }
  0x22   : > { %s1018_s10 = sshll.u32 %s1313_s16, 3  ;;  %s175_s1 = scalar_lea.vmem [#allocation5], %s899_s9 }
  0x23   : > { %s182_s30 = scalar_lea.hbm %s1512_s0, %s1018_s10  ;;  %s185_s7 = sshll.u32 %s175_s1, 4  ;;  %s186_s7 = int_to_ptr.vmem [resolvable:$true] %s185_s7 }
  0x24   : > { %s183_s21 = sshll.u32 %s182_s30, 4  ;;  %s172_s4 = scalar_lea.sflag [#allocation6], %s1415_s28  ;;  %s184_s21 = int_to_ptr.hbm [resolvable:$true] %s183_s21 }
  0x25   : > { %1058 = dma.hbm_to_vmem [thread:$0]  (!%p1419_p0), %s184_s21, 128, %s186_s7, %s172_s4, %s1319_s20, %s1319_s20, %s1320_s26  }
  0x26   : > { %1064 = dma.hbm_to_vmem [thread:$0]  (!%p1419_p0), %s232_s6, 1024, %s234_s8, %s196_s23, %s1319_s20, %s1319_s20, %s1320_s26  }
  0x27   : > { %245 = sbr.rel (%p242_p3) target bundleno = 755 (0x2f3), region = 32  ;;  %s1447_s14 = sand.u32 (!%p242_p3), 1, %s1301_s13  }
  0x28   : > { %s909_s11 = sshll.u32 (!%p242_p3), %s1447_s14, 3  ;;  %s248_s22 = scalar_lea.sflag (!%p242_p3), [#allocation6], %s1447_s14 }
  0x29   : > { %s251_s10 = scalar_lea.vmem (!%p242_p3), [#allocation5], %s909_s11 }
  0x2c   : > { %1284 = dma.done.wait (%p1397_p8), %s248_s22, 128  }
  0x2d   : > { %1286 = vsyncadd (%p1397_p8), %s248_s22, 4294967168  ;;  %s257_s1 = sand.u32 1, %s1377_s18   ;;  %s910_s20 = sshll.u32 %s1447_s14, 6 }
  0x2e   : > { %s258_s26 = scalar_lea.sflag [#allocation9], %s257_s1  ;;  %s261_s28 = scalar_lea.vmem [#allocation8], %s910_s20 }
  0x2f   : > { %1288 = dma.done.wait (%p1397_p8), %s258_s26, 2048  }
  0x30   : > { %1290 = vsyncadd (%p1397_p8), %s258_s26, 4294965248  ;;  %v1029_v0 = vld [vmem:[%s261_s28 + $0x38] sm:$0xff]  ;;  %v1028_v1 = vld [vmem:[%s261_s28 + $0x30] sm:$0xff]  ;;  %vm313_vm0 = vcmask 7168   ;;  %v1321_v9 = vmov -inf   ;;  %v426_v10 = vlaneseq  ;;  %v1322_v16 = vmov 0  }
  0x31   : > { %408 = vmatpush.bf16.xpose.msra.mxu0 %v1029_v0  ;;  %v1027_v2 = vld [vmem:[%s261_s28 + $0x28] sm:$0xff]  ;;  %v1026_v3 = vld [vmem:[%s261_s28 + $0x20] sm:$0xff]  ;;  %v1025_v4 = vld [vmem:[%s261_s28 + $0x18] sm:$0xff]  ;;  %314 = vst.msk [vmem:[#allocation2] sm:$0xff] %vm313_vm0, %v1321_v9  ;;  %1126 = vset.pattern.permute.xlu1 %v1322_v16  ;;  %v1323_v17 = vmov 0.0   ;;  %s271_s18 = scalar_lea.vmem [#allocation10], %s910_s20 }
  0x32   : > { %v1024_v5 = vld [vmem:[%s261_s28 + $0x10] sm:$0xff]  ;;  %v1023_v6 = vld [vmem:[%s261_s28 + $0x8] sm:$0xff]  ;;  %v1022_v7 = vld [vmem:[%s261_s28] sm:$0xff]  ;;  %315 = vst.msk [vmem:[#allocation2 + $0x8] sm:$0xff] %vm313_vm0, %v1321_v9  ;;  %v427_v11 = vand.u32 127, %v426_v10  ;;  %1128 = vset.pattern.permute.xlu2 %v1322_v16  ;;  %1127 = vset.pattern.permute.xlu0 %v1322_v16  ;;  %s912_s24 = sshll.u32 %s1447_s14, 4 }
  0x33   : > { %v1021_v8 = vld [vmem:[%s251_s10] sm:$0xff]  ;;  %316 = vst.msk [vmem:[#allocation3] sm:$0xff] %vm313_vm0, %v1323_v17  ;;  %v1041_v20 = vld [vmem:[%s271_s18 + $0x28] sm:$0xff]  ;;  %v1039_v29 = vld [vmem:[%s271_s18 + $0x20] sm:$0xff]  ;;  %s1046_s29 = sshll.u32 %s1309_s15, 4  ;;  %s304_s9 = scalar_lea.vmem [#allocation11], %s912_s24 }
  0x34   : > { %vm430_vm1 = vcmp.lt.s32.totalorder %v427_v11, 8  ;;  %317 = vst.msk [vmem:[#allocation3 + $0x8] sm:$0xff] %vm313_vm0, %v1323_v17  ;;  %v1045_v18 = vld [vmem:[%s271_s18 + $0x38] sm:$0xff]  ;;  %v1043_v19 = vld [vmem:[%s271_s18 + $0x30] sm:$0xff]  ;;  %v1033_v32 = vld [vmem:[%s271_s18 + $0x8] sm:$0xff]  ;;  %s752_s8 = scalar_lea.hbm %s1515_s3, %s1046_s29  ;;  %s753_s19 = sshll.u32 %s304_s9, 4  ;;  %s754_s19 = int_to_ptr.vmem [resolvable:$true] %s753_s19 }
  0x35   : > { %539 = vmatpush.bf16.msra.mxu1 %v1045_v18  ;;  %v1037_v30 = vld [vmem:[%s271_s18 + $0x18] sm:$0xff]  ;;  %v1035_v31 = vld [vmem:[%s271_s18 + $0x10] sm:$0xff]  ;;  %v1031_v33 = vld [vmem:[%s271_s18] sm:$0xff]  ;;  %s755_s15 = sshll.u32 %s752_s8, 4  ;;  %s739_s5 = scalar_lea.sflag [#allocation7], %s1447_s14  ;;  %s756_s15 = int_to_ptr.hbm [resolvable:$true] %s755_s15 }
  0x36   : > { %s1245_s30 = sshra.s32 %s756_s15, 4  ;;  %s1251_s11 = scalar_lea.hbm %s1515_s3, 32  ;;  %s1246_s30 = int_to_ptr.hbm [resolvable:$true] %s1245_s30 }
  0x37   : > { %s1247_s21 = scalar_lea.hbm %s1246_s30, 16  ;;  %p1252_p7 = scmp.lt.s32.totalorder %s1246_s30, %s1515_s3 }
  0x38   : > { %v433_v21 = vld [vmem:[#allocation2] sm:$0xff]  ;;  %p1248_p4 = scmp.ne.s32.totalorder %s1246_s30, %s1247_s21  ;;  %p1253_p8 = scmp.lt.s32.totalorder %s1251_s11, %s1247_s21 }
  0x39   : > { %409 = vmatpush.bf16.xpose.msra.mxu0 %v1028_v1  ;;  %540 = vmatpush.bf16.msra.mxu1 %v1043_v19  ;;  %v434_v25 = vld [vmem:[#allocation2 + $0x8] sm:$0xff] }
  0x3a   : > { %v463_v46 = vld [vmem:[#allocation3] sm:$0xff]  ;;  %p1249_p5 = pnand %p1248_p4, %p1401_p9  ;;  %p1254_p10 = por %p1253_p8, %p1252_p7 }
  0x3b   : > { %v464_v51 = vld [vmem:[#allocation3 + $0x8] sm:$0xff] }
  0x3c   : > { %p1250_p6 = pneg %p1249_p5 }
  0x3d   : > { %541 = vmatpush.bf16.msra.mxu1 %v1041_v20 }
  0x3e   : > { %p1255_p13 = pnand %p1254_p10, %p1250_p6 }
  0x41   : > { %410 = vmatpush.bf16.xpose.msra.mxu0 %v1027_v2  ;;  %542 = vmatpush.bf16.msra.mxu1 %v1039_v29 }
  0x45   : > { %543 = vmatpush.bf16.msra.mxu1 %v1037_v30 }
  0x49   : > { %411 = vmatpush.bf16.xpose.msra.mxu0 %v1026_v3  ;;  %544 = vmatpush.bf16.msra.mxu1 %v1035_v31 }
  0x4d   : > { %545 = vmatpush.bf16.msra.mxu1 %v1033_v32 }
  0x51   : > { %412 = vmatpush.bf16.xpose.msra.mxu0 %v1025_v4  ;;  %546 = vmatpush.bf16.msra.mxu1 %v1031_v33 }
  0x59   : > { %413 = vmatpush.bf16.xpose.msra.mxu0 %v1024_v5 }
  0x61   : > { %414 = vmatpush.bf16.xpose.msra.mxu0 %v1023_v6 }
  0x69   : > { %415 = vmatpush.bf16.xpose.msra.mxu0 %v1022_v7 }
  0x70   : > { %416 = vmatmul.bf16.vlgmr.msra.gmra.mxu0 %v1021_v8 }
  0xed   : > { %v417_v12 = vpop.f32.mrf.mxu0 }
  0xee   : > { %v431_v13 = vsel %vm430_vm1, %v417_v12, -1e+30 }
  0xef   : > { %435 = vmax.xlane.f32.xlu0 %v431_v13 }
  0xf5   : > { %v419_v14 = vpop.f32.mrf.mxu0 }
  0xf6   : > { %v432_v15 = vsel %vm430_vm1, %v419_v14, -1e+30 }
  0xf7   : > { %437 = vmax.xlane.f32.xlu0 %v432_v15 }
 0x162   : > { %v436_v22 = vpop.xlane.xlu0 %435 }
 0x163   : > { %v439_v23 = vmax.f32 %v433_v21, %v436_v22 }
 0x165   : > { %v441_v24 = vsub.f32 %v433_v21, %v439_v23  ;;  %557 = vst.msk [vmem:[#allocation2] sm:$0xff] %vm313_vm0, %v439_v23  ;;  %449 = vperm.xlu1 %1126, %v439_v23  }
 0x167   : > { %v443_v43 = vmul.f32 1.442695, %v441_v24 }
 0x16a   : > { %v438_v26 = vpop.xlane.xlu0 %437 }
 0x16b   : > { %v440_v27 = vmax.f32 %v434_v25, %v438_v26 }
 0x16d   : > { %v442_v28 = vsub.f32 %v434_v25, %v440_v27  ;;  %558 = vst.msk [vmem:[#allocation2 + $0x8] sm:$0xff] %vm313_vm0, %v440_v27  ;;  %454 = vperm.xlu1 %1126, %v440_v27  }
 0x16f   : > { %v445_v45 = vmul.f32 1.442695, %v442_v28 }
 0x1d7   : > { %v450_v34 = vpop.permute.xlu1 %449 }
 0x1d8   : > { %v457_v35 = vsub.f32 %v431_v13, %v450_v34 }
 0x1da   : > { %v459_v36 = vmul.f32 1.442695, %v457_v35 }
 0x1dc   : > { %1129 = vpow2.f32 %v459_v36 }
 0x1df   : > { %v455_v37 = vpop.permute.xlu1 %454 }
 0x1e0   : > { %v458_v38 = vsub.f32 %v432_v15, %v455_v37 }
 0x1e2   : > { %v1130_v39 = vpop.eup %1129  ;;  %v461_v40 = vmul.f32 1.442695, %v458_v38 }
 0x1e3   : > { %467 = vadd.xlane.f32.xlu2 %v1130_v39 }
 0x1e4   : > { %1131 = vpow2.f32 %v461_v40 }
 0x1e5   : > { %1133 = vpow2.f32 %v443_v43 }
 0x1e6   : > { %1135 = vpow2.f32 %v445_v45 }
 0x1ea   : > { %v1132_v41 = vpop.eup %1131 }
 0x1eb   : > { %469 = vadd.xlane.f32.xlu2 %v1132_v41  ;;  %v490_v42 = vpack.c.bf16 %v1132_v41, %v1130_v39  ;;  %v1134_v44 = vpop.eup %1133 }
 0x1ec   : > { %v465_v47 = vmul.f32 %v1134_v44, %v463_v46  ;;  %v1136_v50 = vpop.eup %1135 }
 0x1ed   : > { %547 = vmatmul.bf16.vlgmr.msra.gmra.mxu1 %v490_v42  ;;  %v466_v52 = vmul.f32 %v1136_v50, %v464_v51 }
 0x203   : > { %480 = vperm.xlu2 %1128, %v1134_v44  }
 0x256   : > { %v468_v48 = vpop.xlane.xlu2 %467 }
 0x257   : > { %v471_v49 = vadd.f32 %v468_v48, %v465_v47 }
 0x259   : > { %474 = vst.msk [vmem:[#allocation3] sm:$0xff] %vm313_vm0, %v471_v49 }
 0x25e   : > { %v470_v53 = vpop.xlane.xlu2 %469 }
 0x25f   : > { %v472_v54 = vadd.f32 %v470_v53, %v466_v52 }
 0x260   : > { %v694_v55 = vld [vmem:[#allocation3] sm:$0xff] }
 0x261   : > { %475 = vst.msk [vmem:[#allocation3 + $0x8] sm:$0xff] %vm313_vm0, %v472_v54  ;;  %698 = vperm.xlu0 %1127, %v694_v55  }
 0x266   : > { %v481_v62 = vpop.permute.xlu2 %480 }
 0x267   : > { %v488_v3 = vmul.f32 0.0, %v481_v62 }
 0x268   : > { %v695_v56 = vld [vmem:[#allocation3 + $0x8] sm:$0xff] }
 0x269   : > { %703 = vperm.xlu1 %1126, %v695_v56  }
 0x26a   : > { %v548_v2 = vpop.f32.mrf.mxu1 }
 0x26b   : > { %v553_v7 = vadd.f32 %v548_v2, %v488_v3 }
 0x271   : > { %485 = vperm.xlu1 %1126, %v1136_v50  }
 0x272   : > { %v550_v19 = vpop.f32.mrf.mxu1 }
 0x2d3   : > { %v699_v57 = vpop.permute.xlu0 %698 }
 0x2d4   : > { %1137 = vrcp.f32 %v699_v57  ;;  %v717_v63 = vand.u32 2147483648, %v699_v57  ;;  %v715_v1 = vand.u32 2147483647, %v699_v57  ;;  %vm711_vm3 = vweird.f32 %v699_v57 }
 0x2d6   : > { %v718_v6 = vor.u32 1.1754944e-38, %v717_v63  ;;  %vm716_vm5 = vcmp.eq.f32.partialorder %v715_v1, 8.507059e+37 }
 0x2da   : > { %v1138_v58 = vpop.eup %1137 }
 0x2db   : > { %v707_v59 = vmul.f32 %v1138_v58, %v699_v57  ;;  %v704_v60 = vpop.permute.xlu1 %703  ;;  %vm712_vm2 = vweird.f32 %v1138_v58 }
 0x2dc   : > { %1139 = vrcp.f32 %v704_v60  ;;  %vm713_vm4 = vmor %vm711_vm3, %vm712_vm2  ;;  %v732_v14 = vand.u32 2147483648, %v704_v60  ;;  %v730_v16 = vand.u32 2147483647, %v704_v60  ;;  %vm726_vm7 = vweird.f32 %v704_v60 }
 0x2dd   : > { %v708_v61 = vsub.f32 1.0, %v707_v59 }
 0x2de   : > { %v733_v20 = vor.u32 1.1754944e-38, %v732_v14  ;;  %vm731_vm9 = vcmp.eq.f32.partialorder %v730_v16, 8.507059e+37 }
 0x2df   : > { %v709_v0 = vmul.f32 %v1138_v58, %v708_v61 }
 0x2e1   : > { %v710_v4 = vadd.f32 %v1138_v58, %v709_v0 }
 0x2e2   : > { %v1140_v5 = vpop.eup %1139 }
 0x2e3   : > { %v714_v8 = vsel %vm713_vm4, %v1138_v58, %v710_v4  ;;  %v722_v9 = vmul.f32 %v1140_v5, %v704_v60  ;;  %v486_v11 = vpop.permute.xlu1 %485  ;;  %vm727_vm6 = vweird.f32 %v1140_v5 }
 0x2e4   : > { %v719_v10 = vsel %vm716_vm5, %v718_v6, %v714_v8  ;;  %v489_v17 = vmul.f32 0.0, %v486_v11  ;;  %vm728_vm8 = vmor %vm726_vm7, %vm727_vm6 }
 0x2e5   : > { %v720_v12 = vmul.f32 %v719_v10, %v553_v7  ;;  %v723_v13 = vsub.f32 1.0, %v722_v9 }
 0x2e6   : > { %v554_v22 = vadd.f32 %v550_v19, %v489_v17 }
 0x2e7   : > { %v724_v15 = vmul.f32 %v1140_v5, %v723_v13  ;;  %736 = vst [vmem:[%s304_s9] sm:$0xff] %v720_v12 }
 0x2e9   : > { %v725_v18 = vadd.f32 %v1140_v5, %v724_v15 }
 0x2eb   : > { %v729_v21 = vsel %vm728_vm8, %v1140_v5, %v725_v18 }
 0x2ec   : > { %v734_v23 = vsel %vm731_vm9, %v733_v20, %v729_v21 }
 0x2ed   : > { %v735_v24 = vmul.f32 %v734_v23, %v554_v22 }
 0x2ef   : > { %737 = vst [vmem:[%s304_s9 + $0x8] sm:$0xff] %v735_v24 }
 0x2f0   : > { %1258 = shalt.err (!%p1255_p13)
}
 0x2f1   : > { %s1324_s14 = smov 128   ;;  %s1325_s1 = smov 8  }
 0x2f2   : > { %1053 = dma.vmem_to_hbm [thread:$0]  (%p1401_p9), %s754_s19, 256, %s756_s15, %s739_s5, %s1324_s14, %s1324_s14, %s1325_s1  }
 0x2f3 PF: > { %s770_s20 = sand.u32 1, %s1297_s12   ;;  %p1066_p0 = pnand %p898_p12, %p1408_p11 }
 0x2f4   : > { %s771_s26 = scalar_lea.sflag [#allocation7], %s770_s20 }
 0x2f5   : > { %p1067_p1 = pneg %p1066_p0 }
 0x2f7   : > { %1292 = dma.done.wait (%p1067_p1), %s771_s26, 256  }
 0x2f8   : > { %1294 = vsyncadd (%p1067_p1), %s771_s26, 4294967040  ;;  %s22_s17 = sadd.s32 1, %s1317_s17   ;;  %s1528_s28 = sld [smem:[#allocation15_spill]] }
 0x2f9   : > { %p19_p2 = scmp.ge.s32.totalorder %s22_s17, 4   ;;  %s1529_s14 = sld [smem:[#allocation17_spill]] }
 0x2fa   : > { %s1530_s25 = sld [smem:[#allocation16_spill]]  ;;  %s1531_s12 = smov %s1301_s13 }
 0x2fb   : > { %s1533_s15 = smov %s1313_s16 }
 0x2fc   :  { %21 = sbr.rel (!%p19_p2) target bundleno = 10 (0xa), region = 117 }
 0x2fe   : > { %s1532_s13 = smov %s1528_s28 }
 0x300   : > { %s1534_s16 = smov %s1530_s25 }
 0x301   :  { %777 = vsyncpa [#allocation6], 1 }
 0x302   :  { %779 = vsyncpa [#allocation6 + $0x1], 1 }
 0x303   :  { %780 = vsyncpa [#allocation9], 1 }
 0x304   :  { %782 = vsyncpa [#allocation9 + $0x1], 1 }
 0x305   :  { %783 = vsyncpa [#allocation7], 1 }
 0x306   :  { %785 = vsyncpa [#allocation7 + $0x1], 1 }

</bundles_post_ra>
